<compile_context>
chip_gen: v5e
topology: v5e:2x2
jax: 0.10.0
libtpu: 0.0.40
codegen_flags: <defaults>
</compile_context>

<pallas_src>
import jax
import jax.numpy as jnp
import numpy as np
from jax.experimental import pallas as pl
from jax.experimental.pallas import tpu as pltpu

HIDDEN = 512
HEAD_PAD = 128  # lane-dense padded width of the (512, 1) output head


def _value_kernel(x_ref,
                  w_in_ref, b_in_ref,
                  w_fc_ref, b_fc_ref,
                  w_out_ref, b_out_ref,
                  out_ref):
    # Layer 1: tiny f32 weight, f32 accumulate.
    h = jnp.dot(x_ref[...], w_in_ref[...],
                preferred_element_type=jnp.float32) + b_in_ref[...]
    h = jnp.maximum(h, 0.0)

    # Layer 2: bf16 x bf16 on the MXU, f32 accumulate; activations stay f32.
    h = jnp.dot(h.astype(w_fc_ref.dtype), w_fc_ref[...],
                preferred_element_type=jnp.float32) + b_fc_ref[...]
    h = jnp.maximum(h, 0.0)

    # Head: (512, 128) zero-padded weight -> one full-lane MXU pass and an
    # unmasked lane-dense (TB, 128) store (column 0 is the value).
    v = jnp.dot(h.astype(w_out_ref.dtype), w_out_ref[...],
                preferred_element_type=jnp.float32) + b_out_ref[...]
    out_ref[...] = v


def _round_up(n, m):
    return ((n + m - 1) // m) * m


def value_net_forward(x, params, *, block_b=256):
    """x: [B, state_num] float32. params: dict from prepare_params()."""
    B, S = x.shape
    TB = min(block_b, _round_up(B, 8))          # batch tile (multiple of 8 sublanes)
    B_pad = _round_up(B, TB)
    if B_pad != B:
        x = jnp.pad(x, ((0, B_pad - B), (0, 0)))

    const = lambda i: (0, 0)                    # weights/biases resident across steps

    out = pl.pallas_call(
        _value_kernel,
        out_shape=jax.ShapeDtypeStruct((B_pad, HEAD_PAD), jnp.float32),
        grid=(B_pad // TB,),
        in_specs=[
            pl.BlockSpec((TB, S), lambda i: (i, 0)),      # activation tile
            pl.BlockSpec((S, HIDDEN), const),
            pl.BlockSpec((1, HIDDEN), const),
            pl.BlockSpec((HIDDEN, HIDDEN), const),
            pl.BlockSpec((1, HIDDEN), const),
            pl.BlockSpec((HIDDEN, HEAD_PAD), const),
            pl.BlockSpec((1, HEAD_PAD), const),
        ],
        out_specs=pl.BlockSpec((TB, HEAD_PAD), lambda i: (i, 0)),
        compiler_params=pltpu.CompilerParams(
            dimension_semantics=("parallel",)),           # shards across v7x's 2 TCs
    )(
        x,
        params["w_in"], params["b_in"],
        params["w_fc"], params["b_fc"],
        params["w_out_pad"], params["b_out_pad"],
    )
    return out[:B, 0:1]


def init_params(key, state_num, hidden=HIDDEN):
    """PyTorch-Linear-style uniform +-1/sqrt(fan_in) init; weights stored transposed
    as (in_features, out_features), biases as (1, out_features)."""
    def linear(k, fan_in, fan_out):
        kw, kb = jax.random.split(k)
        bound = 1.0 / np.sqrt(fan_in)
        w = jax.random.uniform(kw, (fan_in, fan_out), jnp.float32, -bound, bound)
        b = jax.random.uniform(kb, (1, fan_out), jnp.float32, -bound, bound)
        return w, b

    k0, k1, k2 = jax.random.split(key, 3)
    p = {}
    p["w_in"], p["b_in"] = linear(k0, state_num, hidden)
    p["w_fc"], p["b_fc"] = linear(k1, hidden, hidden)
    p["w_out"], p["b_out"] = linear(k2, hidden, 1)
    return p


def prepare_params(p):
    """Kernel-side parameter layout: bf16 big weights, zero-padded lane-dense head."""
    q = {
        "w_in": p["w_in"],                        # 16 KiB; keep f32 (bf16 gains nothing)
        "b_in": p["b_in"],
        "w_fc": p["w_fc"].astype(jnp.bfloat16),   # dominant bytes -> bf16 (halved DMA)
        "b_fc": p["b_fc"],
    }
    w_out = p["w_out"].astype(jnp.bfloat16)
    q["w_out_pad"] = jnp.pad(w_out, ((0, 0), (0, HEAD_PAD - w_out.shape[1])))
    q["b_out_pad"] = jnp.pad(p["b_out"], ((0, 0), (0, HEAD_PAD - p["b_out"].shape[1])))
    return q


def value_net_ref(x, p):
    """Pure-JAX reference with the same bf16-weight / f32-accumulate semantics."""
    h = jnp.maximum(x @ p["w_in"] + p["b_in"], 0.0)
    h = jnp.maximum(
        jnp.dot(h.astype(jnp.bfloat16), p["w_fc"].astype(jnp.bfloat16),
                preferred_element_type=jnp.float32) + p["b_fc"], 0.0)
    v = jnp.dot(h.astype(jnp.bfloat16), p["w_out"].astype(jnp.bfloat16),
                preferred_element_type=jnp.float32) + p["b_out"]
    return v


if __name__ == "__main__":
    STATE_NUM = 8
    BATCH = 8

    key = jax.random.PRNGKey(0)
    kx, kp = jax.random.split(key)
    x = jax.random.normal(kx, (BATCH, STATE_NUM), dtype=jnp.float32)

    params = init_params(kp, STATE_NUM)
    kparams = prepare_params(params)

    value = value_net_forward(x, kparams)
    value = jax.block_until_ready(value)

    value_ref = value_net_ref(x, params)
    assert value.shape == (BATCH, 1)
    assert jnp.allclose(value, value_ref, atol=1e-3, rtol=1e-3), \
        float(jnp.max(jnp.abs(value - value_ref)))

    print("KERNEL_OK")
</pallas_src>

<mosaic_0001>
module attributes {stable_mosaic.version = 11 : i64} {
  func.func @_value_kernel(%arg0: i32, %arg1: memref<8x8xf32, #tpu.memory_space<vmem>>, %arg2: memref<8x512xf32, #tpu.memory_space<vmem>>, %arg3: memref<1x512xf32, #tpu.memory_space<vmem>>, %arg4: memref<512x512xbf16, #tpu.memory_space<vmem>>, %arg5: memref<1x512xf32, #tpu.memory_space<vmem>>, %arg6: memref<512x128xbf16, #tpu.memory_space<vmem>>, %arg7: memref<1x128xf32, #tpu.memory_space<vmem>>, %arg8: memref<8x128xf32, #tpu.memory_space<vmem>>) attributes {dimension_semantics = [#tpu.dimension_semantics<parallel>], iteration_bounds = array<i64: 1>, scalar_prefetch = 0 : i64, scratch_operands = 0 : i64, tpu.core_type = #tpu.core_type<tc>, window_params = [{transform_indices = @transform_0, window_bounds = array<i64: 8, 8>}, {pipeline_mode = #tpu.pipeline_mode<synchronous>, transform_indices = @transform_1, window_bounds = array<i64: 8, 512>}, {pipeline_mode = #tpu.pipeline_mode<synchronous>, transform_indices = @transform_2, window_bounds = array<i64: 1, 512>}, {pipeline_mode = #tpu.pipeline_mode<synchronous>, transform_indices = @transform_3, window_bounds = array<i64: 512, 512>}, {pipeline_mode = #tpu.pipeline_mode<synchronous>, transform_indices = @transform_4, window_bounds = array<i64: 1, 512>}, {pipeline_mode = #tpu.pipeline_mode<synchronous>, transform_indices = @transform_5, window_bounds = array<i64: 512, 128>}, {pipeline_mode = #tpu.pipeline_mode<synchronous>, transform_indices = @transform_6, window_bounds = array<i64: 1, 128>}, {transform_indices = @transform_7, window_bounds = array<i64: 8, 128>}]} {
    %c0 = arith.constant 0 : index
    %c0_0 = arith.constant 0 : index
    %0 = vector.load %arg1[%c0, %c0_0] : memref<8x8xf32, #tpu.memory_space<vmem>>, vector<8x8xf32>
    %c0_1 = arith.constant 0 : index
    %c0_2 = arith.constant 0 : index
    %1 = vector.load %arg2[%c0_1, %c0_2] : memref<8x512xf32, #tpu.memory_space<vmem>>, vector<8x512xf32>
    %cst = arith.constant dense<0.000000e+00> : vector<8x512xf32>
    %2 = tpu.matmul %0, %1, %cst {dimension_numbers = #tpu.dot_dimension_numbers<[1], [0], [0], [1], [0, 0, 1, 1], [], []>} : vector<8x8xf32>, vector<8x512xf32>, vector<8x512xf32> -> vector<8x512xf32>
    %c0_3 = arith.constant 0 : index
    %c0_4 = arith.constant 0 : index
    %3 = vector.load %arg3[%c0_3, %c0_4] : memref<1x512xf32, #tpu.memory_space<vmem>>, vector<1x512xf32>
    %4 = vector.broadcast %3 : vector<1x512xf32> to vector<8x512xf32>
    %5 = arith.addf %2, %4 : vector<8x512xf32>
    %cst_5 = arith.constant 0.000000e+00 : f32
    %6 = vector.broadcast %cst_5 : f32 to vector<8x512xf32>
    %7 = arith.maximumf %5, %6 : vector<8x512xf32>
    %8 = arith.truncf %7 : vector<8x512xf32> to vector<8x512xbf16>
    %c0_6 = arith.constant 0 : index
    %c0_7 = arith.constant 0 : index
    %9 = vector.load %arg4[%c0_6, %c0_7] : memref<512x512xbf16, #tpu.memory_space<vmem>>, vector<512x512xbf16>
    %cst_8 = arith.constant dense<0.000000e+00> : vector<8x512xf32>
    %10 = tpu.matmul %8, %9, %cst_8 {dimension_numbers = #tpu.dot_dimension_numbers<[1], [0], [0], [1], [0, 0, 1, 1], [], []>} : vector<8x512xbf16>, vector<512x512xbf16>, vector<8x512xf32> -> vector<8x512xf32>
    %c0_9 = arith.constant 0 : index
    %c0_10 = arith.constant 0 : index
    %11 = vector.load %arg5[%c0_9, %c0_10] : memref<1x512xf32, #tpu.memory_space<vmem>>, vector<1x512xf32>
    %12 = vector.broadcast %11 : vector<1x512xf32> to vector<8x512xf32>
    %13 = arith.addf %10, %12 : vector<8x512xf32>
    %cst_11 = arith.constant 0.000000e+00 : f32
    %14 = vector.broadcast %cst_11 : f32 to vector<8x512xf32>
    %15 = arith.maximumf %13, %14 : vector<8x512xf32>
    %16 = arith.truncf %15 : vector<8x512xf32> to vector<8x512xbf16>
    %c0_12 = arith.constant 0 : index
    %c0_13 = arith.constant 0 : index
    %17 = vector.load %arg6[%c0_12, %c0_13] : memref<512x128xbf16, #tpu.memory_space<vmem>>, vector<512x128xbf16>
    %cst_14 = arith.constant dense<0.000000e+00> : vector<8x128xf32>
    %18 = tpu.matmul %16, %17, %cst_14 {dimension_numbers = #tpu.dot_dimension_numbers<[1], [0], [0], [1], [0, 0, 1, 1], [], []>} : vector<8x512xbf16>, vector<512x128xbf16>, vector<8x128xf32> -> vector<8x128xf32>
    %c0_15 = arith.constant 0 : index
    %c0_16 = arith.constant 0 : index
    %19 = vector.load %arg7[%c0_15, %c0_16] : memref<1x128xf32, #tpu.memory_space<vmem>>, vector<1x128xf32>
    %20 = vector.broadcast %19 : vector<1x128xf32> to vector<8x128xf32>
    %21 = arith.addf %18, %20 : vector<8x128xf32>
    %c0_17 = arith.constant 0 : index
    %c0_18 = arith.constant 0 : index
    %22 = vector.load %arg8[%c0_17, %c0_18] : memref<8x128xf32, #tpu.memory_space<vmem>>, vector<8x128xf32>
    tpu.vector_store %arg8[%c0_17, %c0_18], %21 {strides = array<i32>} : memref<8x128xf32, #tpu.memory_space<vmem>>, vector<8x128xf32>,
    return
  }
  func.func @transform_0(%arg0: i32) -> (i32, i32) {
    %c0_i32 = arith.constant 0 : i32
    %c0_i32_0 = arith.constant 0 : i32
    return %arg0, %c0_i32 : i32, i32
  }
  func.func @transform_1(%arg0: i32) -> (i32, i32) {
    %c0_i32 = arith.constant 0 : i32
    %c0_i32_0 = arith.constant 0 : i32
    %c0_i32_1 = arith.constant 0 : i32
    return %c0_i32, %c0_i32_0 : i32, i32
  }
  func.func @transform_2(%arg0: i32) -> (i32, i32) {
    %c0_i32 = arith.constant 0 : i32
    %c0_i32_0 = arith.constant 0 : i32
    %c0_i32_1 = arith.constant 0 : i32
    return %c0_i32, %c0_i32_0 : i32, i32
  }
  func.func @transform_3(%arg0: i32) -> (i32, i32) {
    %c0_i32 = arith.constant 0 : i32
    %c0_i32_0 = arith.constant 0 : i32
    %c0_i32_1 = arith.constant 0 : i32
    return %c0_i32, %c0_i32_0 : i32, i32
  }
  func.func @transform_4(%arg0: i32) -> (i32, i32) {
    %c0_i32 = arith.constant 0 : i32
    %c0_i32_0 = arith.constant 0 : i32
    %c0_i32_1 = arith.constant 0 : i32
    return %c0_i32, %c0_i32_0 : i32, i32
  }
  func.func @transform_5(%arg0: i32) -> (i32, i32) {
    %c0_i32 = arith.constant 0 : i32
    %c0_i32_0 = arith.constant 0 : i32
    %c0_i32_1 = arith.constant 0 : i32
    return %c0_i32, %c0_i32_0 : i32, i32
  }
  func.func @transform_6(%arg0: i32) -> (i32, i32) {
    %c0_i32 = arith.constant 0 : i32
    %c0_i32_0 = arith.constant 0 : i32
    %c0_i32_1 = arith.constant 0 : i32
    return %c0_i32, %c0_i32_0 : i32, i32
  }
  func.func @transform_7(%arg0: i32) -> (i32, i32) {
    %c0_i32 = arith.constant 0 : i32
    %c0_i32_0 = arith.constant 0 : i32
    return %arg0, %c0_i32 : i32, i32
  }
}

</mosaic_0001>

<bundles_post_ra>
// kernel: tpu_custom_call.1
= control target key start
LH: loop header
LB: loop body
LE: loop exit
PB: predicated region body
PF: predicated region fallthrough
CT: control target
= control target key end

     0   :  { %12 = vsyncpa [#allocation3], 0  ;;  %s2650_s0 = inlined_call_operand.hbm [shape: f32[8,8], index: 0, kind: input, shape index: {}]   ;;  %s2651_s1 = inlined_call_operand.hbm [shape: f32[8,512], index: 1, kind: input, shape index: {}]   ;;  %s2652_s2 = inlined_call_operand.hbm [shape: f32[1,512], index: 2, kind: input, shape index: {}]   ;;  %s2653_s3 = inlined_call_operand.hbm [shape: bf16[512,512], index: 3, kind: input, shape index: {}]   ;;  %s2654_s4 = inlined_call_operand.hbm [shape: f32[1,512], index: 4, kind: input, shape index: {}]   ;;  %s2655_s5 = inlined_call_operand.hbm [shape: bf16[512,128], index: 5, kind: input, shape index: {}]   ;;  %s2656_s6 = inlined_call_operand.vmem [shape: f32[1,128], index: 6, kind: input, shape index: {}]   ;;  %s2657_s7 = inlined_call_operand.hbm [shape: f32[8,128], index: 7, kind: output, shape index: {}]  }
   0x1   :  { %13 = vsyncpa [#allocation6], 0 }
   0x2   :  { %14 = vsyncpa [#allocation9], 0 }
   0x3   :  { %15 = vsyncpa [#allocation12], 0  ;;  %s33_s26 = sshll.u32 %s2651_s1, 4  ;;  %s34_s26 = int_to_ptr.hbm [resolvable:$true] %s33_s26 }
   0x4   :  { %16 = vsyncpa [#allocation4], 0  ;;  %s2541_s27 = smov [#allocation5]   ;;  %s54_s8 = sshll.u32 %s2653_s3, 4  ;;  %s55_s8 = int_to_ptr.hbm [resolvable:$true] %s54_s8 }
   0x5   :  { %s35_s28 = sshll.u32 %s2541_s27, 4  ;;  %s2542_s9 = smov [#allocation8]   ;;  %s36_s28 = int_to_ptr.vmem [resolvable:$true] %s35_s28 }
   0x6   :  { %38 = dma.hbm_to_vmem [thread:$0]  %s34_s26, 512, %s36_s28, [#allocation6]  }
   0x7   :  { %s56_s10 = sshll.u32 %s2542_s9, 4  ;;  %s2543_s11 = smov 256   ;;  %s57_s10 = int_to_ptr.vmem [resolvable:$true] %s56_s10 }
   0x8   :  { %s2544_s12 = smov 16   ;;  %s22_s1 = sshll.u32 %s2650_s0, 4  ;;  %s23_s1 = int_to_ptr.hbm [resolvable:$true] %s22_s1 }
   0x9   :  { %62 = dma.hbm_to_vmem [thread:$0]  %s55_s8, 16384, %s57_s10, [#allocation9], %s2543_s11, %s2543_s11, %s2544_s12  }
   0xa   :  { %s2545_s15 = smov [#allocation2]   ;;  %s44_s3 = sshll.u32 %s2652_s2, 4  ;;  %s45_s3 = int_to_ptr.hbm [resolvable:$true] %s44_s3 }
   0xb   :  { %s24_s16 = sshll.u32 %s2545_s15, 4  ;;  %s2546_s19 = smov [#allocation7]   ;;  %s25_s16 = int_to_ptr.vmem [resolvable:$true] %s24_s16 }
   0xc   :  { %27 = dma.hbm_to_vmem [thread:$0]  %s23_s1, 128, %s25_s16, [#allocation3]  }
   0xd   :  { %s46_s20 = sshll.u32 %s2546_s19, 4  ;;  %s68_s23 = sshll.u32 %s2654_s4, 4  ;;  %s47_s20 = int_to_ptr.vmem [resolvable:$true] %s46_s20  ;;  %s69_s23 = int_to_ptr.hbm [resolvable:$true] %s68_s23 }
   0xe   :  { %49 = dma.hbm_to_vmem [thread:$0]  %s45_s3, 64, %s47_s20, [#allocation6]  }
   0xf   :  { %s78_s25 = sshll.u32 %s2655_s5, 4  ;;  %s2547_s26 = smov [#allocation10]   ;;  %s79_s25 = int_to_ptr.hbm [resolvable:$true] %s78_s25 }
  0x10   :  { %s70_s27 = sshll.u32 %s2547_s26, 4  ;;  %s2548_s2 = smov [#allocation11]   ;;  %s71_s27 = int_to_ptr.vmem [resolvable:$true] %s70_s27 }
  0x11   :  { %73 = dma.hbm_to_vmem [thread:$0]  %s69_s23, 64, %s71_s27, [#allocation9]  }
  0x12   :  { %s80_s28 = sshll.u32 %s2548_s2, 4  ;;  %s2549_s29 = smov 64   ;;  %s81_s28 = int_to_ptr.vmem [resolvable:$true] %s80_s28 }
  0x13   :  { %s2550_s30 = smov 4  }
  0x14   :  { %86 = dma.hbm_to_vmem [thread:$0]  %s79_s25, 4096, %s81_s28, [#allocation12], %s2549_s29, %s2549_s29, %s2550_s30  }
  0x15   :  { %2531 = dma.done.wait [#allocation3], 128  }
  0x16   :  { %2532 = vsyncadd [#allocation3], 4294967168 }
  0x17   :  { %2533 = dma.done.wait [#allocation6], 576  }
  0x18   :  { %2534 = vsyncadd [#allocation6], 4294966720 }
  0x19   :  { %2535 = dma.done.wait [#allocation9], 16448  }
  0x1a   :  { %2536 = vsyncadd [#allocation9], 4294950848 }
  0x1b   :  { %2537 = dma.done.wait [#allocation12], 4096  }
  0x1c   :  { %2538 = vsyncadd [#allocation12], 4294963200  ;;  %v114_v0 = vld [vmem:[#allocation5] sm:$0xff]  ;;  %v115_v1 = vld [vmem:[#allocation5 + $0x8] sm:$0xff]  ;;  %vm128_vm0 = vcmask 64512   ;;  %s2551_s8 = smov [#allocation13]  }
  0x1d   :  { %v116_v2 = vld [vmem:[#allocation5 + $0x10] sm:$0xff]  ;;  %147 = vmatpush.msra.mxu0 %v114_v0  ;;  %167 = vmatpush.msra.mxu1 %v115_v1  ;;  %v117_v3 = vld [vmem:[#allocation5 + $0x18] sm:$0xff]  ;;  %v1665_v5 = vld [vmem:[#allocation8 + $0xe0] sm:$0xf]  ;;  %s1532_s9 = sshll.u32 %s2551_s8, 4  ;;  %s1534_s12 = sshll.u32 %s2657_s7, 4  ;;  %s1533_s9 = int_to_ptr.vmem [resolvable:$true] %s1532_s9  ;;  %s1535_s12 = int_to_ptr.hbm [resolvable:$true] %s1534_s12 }
  0x1e   :  { %v113_v4 = vld [vmem:[#allocation2] sm:$0xff]  ;;  %187 = vmatpush.msra.mxu2 %v116_v2  ;;  %207 = vmatpush.msra.mxu3 %v117_v3  ;;  %v2221_v6 = vld [vmem:[#allocation8 + $0xec] sm:$0xf0]  ;;  %v1793_v7 = vld [vmem:[#allocation8 + $0x1e0] sm:$0xf] }
  0x1f   :  { %v2253_v8 = vld [vmem:[#allocation8 + $0x1ec] sm:$0xf0]  ;;  %1547 = vmatmul.msk.f32.vlgmr.msra.gmra.mxu0 %vm128_vm0, %v113_v4  ;;  %1548 = vmatmul.msk.f32.vlgmr.msra.gmra.mxu1 %vm128_vm0, %v113_v4  ;;  %v1666_v9 = vor.u32 %v2221_v6, %v1665_v5  ;;  %v1649_v11 = vld [vmem:[#allocation8 + $0xc0] sm:$0xf] }
  0x20   :  { %v1794_v10 = vor.u32 %v2253_v8, %v1793_v7  ;;  %v2217_v12 = vld [vmem:[#allocation8 + $0xcc] sm:$0xf0]  ;;  %v1777_v13 = vld [vmem:[#allocation8 + $0x1c0] sm:$0xf]  ;;  %1549 = vmatmul.msk.f32.vlgmr.msra.gmra.mxu2 %vm128_vm0, %v113_v4  ;;  %1550 = vmatmul.msk.f32.vlgmr.msra.gmra.mxu3 %vm128_vm0, %v113_v4 }
  0x21   :  { %v2249_v14 = vld [vmem:[#allocation8 + $0x1cc] sm:$0xf0]  ;;  %v1921_v15 = vld [vmem:[#allocation8 + $0x2e0] sm:$0xf]  ;;  %998 = vmatpush.bf16.msrb.mxu0 %v1666_v9  ;;  %v1650_v17 = vor.u32 %v2217_v12, %v1649_v11 }
  0x22   :  { %v2285_v16 = vld [vmem:[#allocation8 + $0x2ec] sm:$0xf0]  ;;  %1011 = vmatpush.bf16.msrb.mxu1 %v1794_v10  ;;  %v1778_v18 = vor.u32 %v2249_v14, %v1777_v13  ;;  %v2049_v20 = vld [vmem:[#allocation8 + $0x3e0] sm:$0xf] }
  0x23   :  { %v1922_v19 = vor.u32 %v2285_v16, %v1921_v15  ;;  %v2317_v21 = vld [vmem:[#allocation8 + $0x3ec] sm:$0xf0]  ;;  %v1633_v22 = vld [vmem:[#allocation8 + $0xa0] sm:$0xf] }
  0x24   :  { %v2050_v23 = vor.u32 %v2317_v21, %v2049_v20  ;;  %v2213_v24 = vld [vmem:[#allocation8 + $0xac] sm:$0xf0]  ;;  %v1761_v25 = vld [vmem:[#allocation8 + $0x1a0] sm:$0xf] }
  0x25   :  { %v2245_v26 = vld [vmem:[#allocation8 + $0x1ac] sm:$0xf0]  ;;  %1024 = vmatpush.bf16.msrb.mxu2 %v1922_v19  ;;  %v1905_v27 = vld [vmem:[#allocation8 + $0x2c0] sm:$0xf]  ;;  %999 = vmatpush.bf16.msrb.mxu0 %v1650_v17  ;;  %v1634_v34 = vor.u32 %v2213_v24, %v1633_v22 }
  0x26   :  { %v2281_v28 = vld [vmem:[#allocation8 + $0x2cc] sm:$0xf0]  ;;  %v2033_v29 = vld [vmem:[#allocation8 + $0x3c0] sm:$0xf]  ;;  %1037 = vmatpush.bf16.msrb.mxu3 %v2050_v23  ;;  %1012 = vmatpush.bf16.msrb.mxu1 %v1778_v18  ;;  %v1762_v35 = vor.u32 %v2245_v26, %v1761_v25 }
  0x27   :  { %v1906_v30 = vor.u32 %v2281_v28, %v1905_v27  ;;  %v2313_v31 = vld [vmem:[#allocation8 + $0x3cc] sm:$0xf0]  ;;  %v1617_v32 = vld [vmem:[#allocation8 + $0x80] sm:$0xf]  ;;  %v2219_v27 = vld [vmem:[#allocation8 + $0xe4] sm:$0xf] }
  0x28   :  { %v2209_v33 = vld [vmem:[#allocation8 + $0x8c] sm:$0xf0]  ;;  %v2034_v36 = vor.u32 %v2313_v31, %v2033_v29  ;;  %v1745_v37 = vld [vmem:[#allocation8 + $0x180] sm:$0xf]  ;;  %v1667_v28 = vld [vmem:[#allocation8 + $0xf0] sm:$0xf0] }
  0x29   :  { %v2241_v38 = vld [vmem:[#allocation8 + $0x18c] sm:$0xf0]  ;;  %v1889_v39 = vld [vmem:[#allocation8 + $0x2a0] sm:$0xf]  ;;  %1025 = vmatpush.bf16.msrb.mxu2 %v1906_v30  ;;  %1000 = vmatpush.bf16.msrb.mxu0 %v1634_v34  ;;  %v1618_v47 = vor.u32 %v2209_v33, %v1617_v32  ;;  %v2251_v29 = vld [vmem:[#allocation8 + $0x1e4] sm:$0xf] }
  0x2a   :  { %v2277_v40 = vld [vmem:[#allocation8 + $0x2ac] sm:$0xf0]  ;;  %v2017_v41 = vld [vmem:[#allocation8 + $0x3a0] sm:$0xf]  ;;  %1038 = vmatpush.bf16.msrb.mxu3 %v2034_v36  ;;  %1013 = vmatpush.bf16.msrb.mxu1 %v1762_v35  ;;  %v1746_v48 = vor.u32 %v2241_v38, %v1745_v37  ;;  %v1795_v30 = vld [vmem:[#allocation8 + $0x1f0] sm:$0xf0] }
  0x2b   :  { %v2309_v42 = vld [vmem:[#allocation8 + $0x3ac] sm:$0xf0]  ;;  %v1890_v43 = vor.u32 %v2277_v40, %v1889_v39  ;;  %v1873_v45 = vld [vmem:[#allocation8 + $0x280] sm:$0xf]  ;;  %v2283_v39 = vld [vmem:[#allocation8 + $0x2e4] sm:$0xf] }
  0x2c   :  { %v2018_v44 = vor.u32 %v2309_v42, %v2017_v41  ;;  %v2273_v46 = vld [vmem:[#allocation8 + $0x28c] sm:$0xf0]  ;;  %v1601_v49 = vld [vmem:[#allocation8 + $0x60] sm:$0xf]  ;;  %v1923_v40 = vld [vmem:[#allocation8 + $0x2f0] sm:$0xf0]  ;;  %v1670_v41 = vor.u32 %v2219_v27, %v1667_v28  ;;  %v1798_v42 = vor.u32 %v2251_v29, %v1795_v30 }
  0x2d   :  { %v2001_v50 = vld [vmem:[#allocation8 + $0x380] sm:$0xf]  ;;  %v2305_v51 = vld [vmem:[#allocation8 + $0x38c] sm:$0xf0]  ;;  %1026 = vmatpush.bf16.msrb.mxu2 %v1890_v43  ;;  %v1874_v55 = vor.u32 %v2273_v46, %v1873_v45  ;;  %1001 = vmatpush.bf16.msrb.mxu0 %v1618_v47  ;;  %v2215_v43 = vld [vmem:[#allocation8 + $0xc4] sm:$0xf] }
  0x2e   :  { %v2205_v52 = vld [vmem:[#allocation8 + $0x6c] sm:$0xf0]  ;;  %v1729_v53 = vld [vmem:[#allocation8 + $0x160] sm:$0xf]  ;;  %1039 = vmatpush.bf16.msrb.mxu3 %v2018_v44  ;;  %v2002_v56 = vor.u32 %v2305_v51, %v2001_v50  ;;  %1014 = vmatpush.bf16.msrb.mxu1 %v1746_v48  ;;  %v2315_v44 = vld [vmem:[#allocation8 + $0x3e4] sm:$0xf]  ;;  %v1926_v51 = vor.u32 %v2283_v39, %v1923_v40 }
  0x2f   :  { %v2237_v54 = vld [vmem:[#allocation8 + $0x16c] sm:$0xf0]  ;;  %v1857_v57 = vld [vmem:[#allocation8 + $0x260] sm:$0xf]  ;;  %v1602_v59 = vor.u32 %v2205_v52, %v1601_v49  ;;  %v2051_v45 = vld [vmem:[#allocation8 + $0x3f0] sm:$0xf0] }
  0x30   :  { %v2269_v58 = vld [vmem:[#allocation8 + $0x26c] sm:$0xf0]  ;;  %v1730_v60 = vor.u32 %v2237_v54, %v1729_v53  ;;  %v1585_v61 = vld [vmem:[#allocation8 + $0x40] sm:$0xf]  ;;  %v1651_v46 = vld [vmem:[#allocation8 + $0xd0] sm:$0xf0]  ;;  %v2054_v52 = vor.u32 %v2315_v44, %v2051_v45 }
  0x31   :  { %v1985_v62 = vld [vmem:[#allocation8 + $0x360] sm:$0xf]  ;;  %v2301_v63 = vld [vmem:[#allocation8 + $0x36c] sm:$0xf0]  ;;  %1027 = vmatpush.bf16.msrb.mxu2 %v1874_v55  ;;  %v1858_v3 = vor.u32 %v2269_v58, %v1857_v57  ;;  %1002 = vmatpush.bf16.msrb.mxu0 %v1602_v59  ;;  %v2247_v47 = vld [vmem:[#allocation8 + $0x1c4] sm:$0xf]  ;;  %v1654_v55 = vor.u32 %v2215_v43, %v1651_v46 }
  0x32   :  { %v2201_v0 = vld [vmem:[#allocation8 + $0x4c] sm:$0xf0]  ;;  %v1713_v1 = vld [vmem:[#allocation8 + $0x140] sm:$0xf]  ;;  %1040 = vmatpush.bf16.msrb.mxu3 %v2002_v56  ;;  %v1986_v4 = vor.u32 %v2301_v63, %v1985_v62  ;;  %1015 = vmatpush.bf16.msrb.mxu1 %v1730_v60  ;;  %v1779_v48 = vld [vmem:[#allocation8 + $0x1d0] sm:$0xf0] }
  0x33   :  { %v2233_v2 = vld [vmem:[#allocation8 + $0x14c] sm:$0xf0]  ;;  %v1841_v5 = vld [vmem:[#allocation8 + $0x240] sm:$0xf]  ;;  %v1586_v7 = vor.u32 %v2201_v0, %v1585_v61  ;;  %v2279_v53 = vld [vmem:[#allocation8 + $0x2c4] sm:$0xf]  ;;  %v1782_v56 = vor.u32 %v2247_v47, %v1779_v48 }
  0x34   :  { %v2265_v6 = vld [vmem:[#allocation8 + $0x24c] sm:$0xf0]  ;;  %v1714_v8 = vor.u32 %v2233_v2, %v1713_v1  ;;  %v1569_v9 = vld [vmem:[#allocation8 + $0x20] sm:$0xf]  ;;  %v1907_v54 = vld [vmem:[#allocation8 + $0x2d0] sm:$0xf0] }
  0x35   :  { %v1969_v10 = vld [vmem:[#allocation8 + $0x340] sm:$0xf]  ;;  %v2297_v11 = vld [vmem:[#allocation8 + $0x34c] sm:$0xf0]  ;;  %1028 = vmatpush.bf16.msrb.mxu2 %v1858_v3  ;;  %v1842_v15 = vor.u32 %v2265_v6, %v1841_v5  ;;  %1003 = vmatpush.bf16.msrb.mxu0 %v1586_v7  ;;  %v2211_v57 = vld [vmem:[#allocation8 + $0xa4] sm:$0xf]  ;;  %v1910_v63 = vor.u32 %v2279_v53, %v1907_v54 }
  0x36   :  { %v2197_v12 = vld [vmem:[#allocation8 + $0x2c] sm:$0xf0]  ;;  %v1697_v13 = vld [vmem:[#allocation8 + $0x120] sm:$0xf]  ;;  %1041 = vmatpush.bf16.msrb.mxu3 %v1986_v4  ;;  %v1970_v16 = vor.u32 %v2297_v11, %v1969_v10  ;;  %1016 = vmatpush.bf16.msrb.mxu1 %v1714_v8  ;;  %v2311_v58 = vld [vmem:[#allocation8 + $0x3c4] sm:$0xf] }
  0x37   :  { %v2229_v14 = vld [vmem:[#allocation8 + $0x12c] sm:$0xf0]  ;;  %v1553_v17 = vld [vmem:[#allocation8] sm:$0xf]  ;;  %v1570_v20 = vor.u32 %v2197_v12, %v1569_v9  ;;  %v2035_v59 = vld [vmem:[#allocation8 + $0x3d0] sm:$0xf0] }
  0x38   :  { %v1825_v18 = vld [vmem:[#allocation8 + $0x220] sm:$0xf]  ;;  %v2261_v19 = vld [vmem:[#allocation8 + $0x22c] sm:$0xf0]  ;;  %v1698_v21 = vor.u32 %v2229_v14, %v1697_v13  ;;  %v1635_v60 = vld [vmem:[#allocation8 + $0xb0] sm:$0xf0]  ;;  %v2038_v0 = vor.u32 %v2311_v58, %v2035_v59 }
  0x39   :  { %v2193_v22 = vld [vmem:[#allocation8 + $0xc] sm:$0xf0]  ;;  %v1953_v23 = vld [vmem:[#allocation8 + $0x320] sm:$0xf]  ;;  %1029 = vmatpush.bf16.msrb.mxu2 %v1842_v15  ;;  %v1826_v31 = vor.u32 %v2261_v19, %v1825_v18  ;;  %1004 = vmatpush.bf16.msrb.mxu0 %v1570_v20  ;;  %v2243_v61 = vld [vmem:[#allocation8 + $0x1a4] sm:$0xf]  ;;  %v1638_v3 = vor.u32 %v2211_v57, %v1635_v60 }
  0x3a   :  { %v2293_v24 = vld [vmem:[#allocation8 + $0x32c] sm:$0xf0]  ;;  %v1681_v25 = vld [vmem:[#allocation8 + $0x100] sm:$0xf]  ;;  %1042 = vmatpush.bf16.msrb.mxu3 %v1970_v16  ;;  %1017 = vmatpush.bf16.msrb.mxu1 %v1698_v21  ;;  %v1554_v36 = vor.u32 %v2193_v22, %v1553_v17  ;;  %v1763_v62 = vld [vmem:[#allocation8 + $0x1b0] sm:$0xf0] }
  0x3b   :  { %v2225_v26 = vld [vmem:[#allocation8 + $0x10c] sm:$0xf0]  ;;  %v1954_v32 = vor.u32 %v2293_v24, %v1953_v23  ;;  %v1809_v33 = vld [vmem:[#allocation8 + $0x200] sm:$0xf]  ;;  %v2275_v1 = vld [vmem:[#allocation8 + $0x2a4] sm:$0xf]  ;;  %v1766_v4 = vor.u32 %v2243_v61, %v1763_v62 }
  0x3c   :  { %v2257_v34 = vld [vmem:[#allocation8 + $0x20c] sm:$0xf0]  ;;  %v1937_v35 = vld [vmem:[#allocation8 + $0x300] sm:$0xf]  ;;  %v1682_v37 = vor.u32 %v2225_v26, %v1681_v25  ;;  %v1891_v2 = vld [vmem:[#allocation8 + $0x2b0] sm:$0xf0] }
  0x3d   :  { %v2289_v38 = vld [vmem:[#allocation8 + $0x30c] sm:$0xf0]  ;;  %1030 = vmatpush.bf16.msrb.mxu2 %v1826_v31  ;;  %v1810_v49 = vor.u32 %v2257_v34, %v1809_v33  ;;  %1005 = vmatpush.bf16.msrb.mxu0 %v1554_v36  ;;  %v2207_v5 = vld [vmem:[#allocation8 + $0x84] sm:$0xf]  ;;  %v2019_v7 = vld [vmem:[#allocation8 + $0x3b0] sm:$0xf0]  ;;  %v1894_v11 = vor.u32 %v2275_v1, %v1891_v2 }
  0x3e   :  { %1043 = vmatpush.bf16.msrb.mxu3 %v1954_v32  ;;  %v1938_v50 = vor.u32 %v2289_v38, %v1937_v35  ;;  %1018 = vmatpush.bf16.msrb.mxu1 %v1682_v37  ;;  %v2307_v6 = vld [vmem:[#allocation8 + $0x3a4] sm:$0xf]  ;;  %v1619_v8 = vld [vmem:[#allocation8 + $0x90] sm:$0xf0] }
  0x3f   :  { %v2239_v9 = vld [vmem:[#allocation8 + $0x184] sm:$0xf]  ;;  %v1747_v10 = vld [vmem:[#allocation8 + $0x190] sm:$0xf0]  ;;  %v2022_v12 = vor.u32 %v2307_v6, %v2019_v7  ;;  %v1622_v15 = vor.u32 %v2207_v5, %v1619_v8  ;;  %v118_v5 = vld [vmem:[#allocation7] sm:$0xf] }
  0x40   :  { %v2271_v13 = vld [vmem:[#allocation8 + $0x284] sm:$0xf]  ;;  %v1875_v14 = vld [vmem:[#allocation8 + $0x290] sm:$0xf0]  ;;  %v1750_v16 = vor.u32 %v2239_v9, %v1747_v10  ;;  %v120_v6 = vperm.slane %v118_v5, 0  ;;  %v121_v7 = vperm.slane %v118_v5, 1 }
  0x41   :  { %1050 = vmatpush.bf16.msra.mxu0 %v1670_v41  ;;  %1031 = vmatpush.bf16.msrb.mxu2 %v1810_v49  ;;  %v2203_v17 = vld [vmem:[#allocation8 + $0x64] sm:$0xf]  ;;  %v2003_v19 = vld [vmem:[#allocation8 + $0x390] sm:$0xf0]  ;;  %v1878_v23 = vor.u32 %v2271_v13, %v1875_v14  ;;  %v1673_v10 = vld [vmem:[#allocation8 + $0xe8] sm:$0xf] }
  0x42   :  { %1063 = vmatpush.bf16.msra.mxu1 %v1798_v42  ;;  %1044 = vmatpush.bf16.msrb.mxu3 %v1938_v50  ;;  %v2303_v18 = vld [vmem:[#allocation8 + $0x384] sm:$0xf]  ;;  %v1603_v20 = vld [vmem:[#allocation8 + $0x70] sm:$0xf0]  ;;  %v2222_v13 = vld [vmem:[#allocation8 + $0xf4] sm:$0xf0] }
  0x43   :  { %v2235_v21 = vld [vmem:[#allocation8 + $0x164] sm:$0xf]  ;;  %v1731_v22 = vld [vmem:[#allocation8 + $0x170] sm:$0xf0]  ;;  %v2006_v24 = vor.u32 %v2303_v18, %v2003_v19  ;;  %v1606_v25 = vor.u32 %v2203_v17, %v1603_v20  ;;  %v1801_v14 = vld [vmem:[#allocation8 + $0x1e8] sm:$0xf]  ;;  %v1674_v20 = vor.u32 %v2222_v13, %v1673_v10 }
  0x44   :  { %v1734_v26 = vor.u32 %v2235_v21, %v1731_v22  ;;  %v2199_v27 = vld [vmem:[#allocation8 + $0x44] sm:$0xf]  ;;  %v1587_v28 = vld [vmem:[#allocation8 + $0x50] sm:$0xf0]  ;;  %v122_v18 = vperm.slane %v118_v5, 2  ;;  %v123_v19 = vperm.slane %v118_v5, 3 }
  0x45   :  { %1076 = vmatpush.bf16.msra.mxu2 %v1926_v51  ;;  %1051 = vmatpush.bf16.msra.mxu0 %v1654_v55  ;;  %v2231_v29 = vld [vmem:[#allocation8 + $0x144] sm:$0xf]  ;;  %v1715_v30 = vld [vmem:[#allocation8 + $0x150] sm:$0xf0]  ;;  %v1590_v31 = vor.u32 %v2199_v27, %v1587_v28  ;;  %v1657_v22 = vld [vmem:[#allocation8 + $0xc8] sm:$0xf] }
  0x46   :  { %1089 = vmatpush.bf16.msra.mxu3 %v2054_v52  ;;  %1064 = vmatpush.bf16.msra.mxu1 %v1782_v56  ;;  %v1718_v32 = vor.u32 %v2231_v29, %v1715_v30  ;;  %v2267_v33 = vld [vmem:[#allocation8 + $0x264] sm:$0xf]  ;;  %v1859_v34 = vld [vmem:[#allocation8 + $0x270] sm:$0xf0]  ;;  %v2250_v27 = vld [vmem:[#allocation8 + $0x1d4] sm:$0xf0] }
  0x47   :  { %v2299_v35 = vld [vmem:[#allocation8 + $0x364] sm:$0xf]  ;;  %v1862_v36 = vor.u32 %v2267_v33, %v1859_v34  ;;  %v1987_v37 = vld [vmem:[#allocation8 + $0x370] sm:$0xf0]  ;;  %v2057_v33 = vld [vmem:[#allocation8 + $0x3e8] sm:$0xf] }
  0x48   :  { %v1990_v38 = vor.u32 %v2299_v35, %v1987_v37  ;;  %v2195_v39 = vld [vmem:[#allocation8 + $0x24] sm:$0xf]  ;;  %v1571_v40 = vld [vmem:[#allocation8 + $0x30] sm:$0xf0]  ;;  %v2318_v37 = vld [vmem:[#allocation8 + $0x3f4] sm:$0xf0] }
  0x49   :  { %1077 = vmatpush.bf16.msra.mxu2 %v1910_v63  ;;  %1052 = vmatpush.bf16.msra.mxu0 %v1638_v3  ;;  %v1574_v41 = vor.u32 %v2195_v39, %v1571_v40  ;;  %v2227_v42 = vld [vmem:[#allocation8 + $0x124] sm:$0xf]  ;;  %v1699_v43 = vld [vmem:[#allocation8 + $0x130] sm:$0xf0]  ;;  %v2214_v39 = vld [vmem:[#allocation8 + $0xb4] sm:$0xf0] }
  0x4a   :  { %1090 = vmatpush.bf16.msra.mxu3 %v2038_v0  ;;  %1065 = vmatpush.bf16.msra.mxu1 %v1766_v4  ;;  %v1702_v44 = vor.u32 %v2227_v42, %v1699_v43  ;;  %v2263_v45 = vld [vmem:[#allocation8 + $0x244] sm:$0xf]  ;;  %v1843_v46 = vld [vmem:[#allocation8 + $0x250] sm:$0xf0]  ;;  %v1769_v40 = vld [vmem:[#allocation8 + $0x1a8] sm:$0xf] }
  0x4b   :  { %v2295_v47 = vld [vmem:[#allocation8 + $0x344] sm:$0xf]  ;;  %v1846_v48 = vor.u32 %v2263_v45, %v1843_v46  ;;  %v1971_v49 = vld [vmem:[#allocation8 + $0x350] sm:$0xf0]  ;;  %v2058_v45 = vor.u32 %v2318_v37, %v2057_v33  ;;  %v2238_v5 = vld [vmem:[#allocation8 + $0x174] sm:$0xf0] }
  0x4c   :  { %v1974_v50 = vor.u32 %v2295_v47, %v1971_v49  ;;  %v2191_v51 = vld [vmem:[#allocation8 + $0x4] sm:$0xf]  ;;  %v1555_v52 = vld [vmem:[#allocation8 + $0x10] sm:$0xf0]  ;;  %v1913_v47 = vld [vmem:[#allocation8 + $0x2c8] sm:$0xf] }
  0x4d   :  { %1078 = vmatpush.bf16.msra.mxu2 %v1894_v11  ;;  %1053 = vmatpush.bf16.msra.mxu0 %v1622_v15  ;;  %v2223_v53 = vld [vmem:[#allocation8 + $0x104] sm:$0xf]  ;;  %v1558_v54 = vor.u32 %v2191_v51, %v1555_v52  ;;  %v1683_v55 = vld [vmem:[#allocation8 + $0x110] sm:$0xf0]  ;;  %v2254_v15 = vld [vmem:[#allocation8 + $0x1f4] sm:$0xf0] }
  0x4e   :  { %1091 = vmatpush.bf16.msra.mxu3 %v2022_v12  ;;  %1066 = vmatpush.bf16.msra.mxu1 %v1750_v16  ;;  %v1686_v56 = vor.u32 %v2223_v53, %v1683_v55  ;;  %v2259_v57 = vld [vmem:[#allocation8 + $0x224] sm:$0xf]  ;;  %v1827_v58 = vld [vmem:[#allocation8 + $0x230] sm:$0xf0]  ;;  %v1802_v21 = vor.u32 %v2254_v15, %v1801_v14  ;;  %v2041_v52 = vld [vmem:[#allocation8 + $0x3c8] sm:$0xf] }
  0x4f   :  { %v1830_v59 = vor.u32 %v2259_v57, %v1827_v58  ;;  %v2291_v60 = vld [vmem:[#allocation8 + $0x324] sm:$0xf]  ;;  %v1955_v61 = vld [vmem:[#allocation8 + $0x330] sm:$0xf0]  ;;  %v2314_v53 = vld [vmem:[#allocation8 + $0x3d4] sm:$0xf0] }
  0x50   :  { %v1958_v62 = vor.u32 %v2291_v60, %v1955_v61  ;;  %v2255_v63 = vld [vmem:[#allocation8 + $0x204] sm:$0xf]  ;;  %v1811_v0 = vld [vmem:[#allocation8 + $0x210] sm:$0xf0]  ;;  %v2210_v55 = vld [vmem:[#allocation8 + $0x94] sm:$0xf0] }
  0x51   :  { %1079 = vmatpush.bf16.msra.mxu2 %v1878_v23  ;;  %1054 = vmatpush.bf16.msra.mxu0 %v1606_v25  ;;  %v1814_v1 = vor.u32 %v2255_v63, %v1811_v0  ;;  %v2287_v2 = vld [vmem:[#allocation8 + $0x304] sm:$0xf]  ;;  %v1939_v3 = vld [vmem:[#allocation8 + $0x310] sm:$0xf0]  ;;  %v2218_v23 = vld [vmem:[#allocation8 + $0xd4] sm:$0xf0] }
  0x52   :  { %1092 = vmatpush.bf16.msra.mxu3 %v2006_v24  ;;  %1067 = vmatpush.bf16.msra.mxu1 %v1734_v26  ;;  %v1942_v4 = vor.u32 %v2287_v2, %v1939_v3  ;;  %v1785_v26 = vld [vmem:[#allocation8 + $0x1c8] sm:$0xf]  ;;  %v1658_v30 = vor.u32 %v2218_v23, %v1657_v22  ;;  %v2242_v57 = vld [vmem:[#allocation8 + $0x194] sm:$0xf0] }
  0x53   :  { %v1897_v60 = vld [vmem:[#allocation8 + $0x2a8] sm:$0xf]  ;;  %v2278_v63 = vld [vmem:[#allocation8 + $0x2b4] sm:$0xf0] }
  0x54   :  { %v2025_v0 = vld [vmem:[#allocation8 + $0x3a8] sm:$0xf]  ;;  %v2206_v3 = vld [vmem:[#allocation8 + $0x74] sm:$0xf0] }
  0x55   :  { %1055 = vmatpush.bf16.msra.mxu0 %v1590_v31  ;;  %1080 = vmatpush.bf16.msra.mxu2 %v1862_v36  ;;  %v1929_v31 = vld [vmem:[#allocation8 + $0x2e8] sm:$0xf]  ;;  %v1786_v36 = vor.u32 %v2250_v27, %v1785_v26  ;;  %v2202_v15 = vld [vmem:[#allocation8 + $0x54] sm:$0xf0] }
  0x56   :  { %1068 = vmatpush.bf16.msra.mxu1 %v1718_v32  ;;  %1093 = vmatpush.bf16.msra.mxu3 %v1990_v38  ;;  %v2286_v32 = vld [vmem:[#allocation8 + $0x2f4] sm:$0xf0]  ;;  %v1641_v38 = vld [vmem:[#allocation8 + $0xa8] sm:$0xf] }
  0x57   :  { %v1642_v46 = vor.u32 %v2214_v39, %v1641_v38  ;;  %v1609_v2 = vld [vmem:[#allocation8 + $0x68] sm:$0xf]  ;;  %v2302_v23 = vld [vmem:[#allocation8 + $0x374] sm:$0xf0] }
  0x58   :  { %v2009_v10 = vld [vmem:[#allocation8 + $0x388] sm:$0xf]  ;;  %v2298_v37 = vld [vmem:[#allocation8 + $0x354] sm:$0xf0] }
  0x59   :  { %1056 = vmatpush.bf16.msra.mxu0 %v1574_v41  ;;  %1081 = vmatpush.bf16.msra.mxu2 %v1846_v48  ;;  %v2246_v41 = vld [vmem:[#allocation8 + $0x1b4] sm:$0xf0]  ;;  %v1593_v14 = vld [vmem:[#allocation8 + $0x48] sm:$0xf] }
  0x5a   :  { %1069 = vmatpush.bf16.msra.mxu1 %v1702_v44  ;;  %1094 = vmatpush.bf16.msra.mxu3 %v1974_v50  ;;  %v1930_v44 = vor.u32 %v2286_v32, %v1929_v31  ;;  %v2282_v48 = vld [vmem:[#allocation8 + $0x2d4] sm:$0xf0]  ;;  %v1770_v51 = vor.u32 %v2246_v41, %v1769_v40  ;;  %v1993_v22 = vld [vmem:[#allocation8 + $0x368] sm:$0xf]  ;;  %v1594_v26 = vor.u32 %v2202_v15, %v1593_v14  ;;  %v1643_v15 = vld [vmem:[#allocation8 + $0xb8] sm:$0xf0] }
  0x5b   :  { %v1914_v58 = vor.u32 %v2282_v48, %v1913_v47  ;;  %v2230_v31 = vld [vmem:[#allocation8 + $0x134] sm:$0xf0]  ;;  %v1994_v33 = vor.u32 %v2302_v23, %v1993_v22  ;;  %v1561_v40 = vld [vmem:[#allocation8 + $0x8] sm:$0xf]  ;;  %v2252_v48 = vld [vmem:[#allocation8 + $0x1ec] sm:$0xf] }
  0x5c   :  { %v2194_v41 = vld [vmem:[#allocation8 + $0x14] sm:$0xf0]  ;;  %v2312_v22 = vld [vmem:[#allocation8 + $0x3cc] sm:$0xf]  ;;  %v2043_v23 = vld [vmem:[#allocation8 + $0x3d8] sm:$0xf0] }
  0x5d   :  { %1057 = vmatpush.bf16.msra.mxu0 %v1558_v54  ;;  %1082 = vmatpush.bf16.msra.mxu2 %v1830_v59  ;;  %v1625_v54 = vld [vmem:[#allocation8 + $0x88] sm:$0xf]  ;;  %v2042_v59 = vor.u32 %v2314_v53, %v2041_v52  ;;  %v2262_v53 = vld [vmem:[#allocation8 + $0x234] sm:$0xf0] }
  0x5e   :  { %1070 = vmatpush.bf16.msra.mxu1 %v1686_v56  ;;  %1095 = vmatpush.bf16.msra.mxu3 %v1958_v62  ;;  %v1753_v56 = vld [vmem:[#allocation8 + $0x188] sm:$0xf]  ;;  %v1626_v61 = vor.u32 %v2210_v55, %v1625_v54  ;;  %v2294_v55 = vld [vmem:[#allocation8 + $0x334] sm:$0xf0] }
  0x5f   :  { %v1754_v62 = vor.u32 %v2242_v57, %v1753_v56  ;;  %v1833_v52 = vld [vmem:[#allocation8 + $0x228] sm:$0xf]  ;;  %v1562_v56 = vor.u32 %v2194_v41, %v1561_v40  ;;  %v2204_v40 = vld [vmem:[#allocation8 + $0x6c] sm:$0xf]  ;;  %v1611_v41 = vld [vmem:[#allocation8 + $0x78] sm:$0xf0] }
  0x60   :  { %v1961_v54 = vld [vmem:[#allocation8 + $0x328] sm:$0xf] }
  0x61   :  { %1083 = vmatpush.bf16.msra.mxu2 %v1814_v1  ;;  %v2310_v1 = vld [vmem:[#allocation8 + $0x3b4] sm:$0xf0] }
  0x62   :  { %1096 = vmatpush.bf16.msra.mxu3 %v1942_v4  ;;  %v1737_v4 = vld [vmem:[#allocation8 + $0x168] sm:$0xf] }
  0x63   :  { %v1738_v13 = vor.u32 %v2238_v5, %v1737_v4  ;;  %v1945_v4 = vld [vmem:[#allocation8 + $0x308] sm:$0xf]  ;;  %v2290_v5 = vld [vmem:[#allocation8 + $0x314] sm:$0xf0] }
  0x64   :  { %v1946_v14 = vor.u32 %v2290_v5, %v1945_v4  ;;  %v2228_v4 = vld [vmem:[#allocation8 + $0x12c] sm:$0xf]  ;;  %v1707_v5 = vld [vmem:[#allocation8 + $0x138] sm:$0xf0] }
  0x9c   :  { %v149_v8 = vpop.f32.mrf.mxu0  ;;  %v169_v9 = vpop.f32.mrf.mxu1 }
  0x9d   :  { %v150_v11 = vadd.f32 %v149_v8, %v120_v6  ;;  %v170_v12 = vadd.f32 %v169_v9, %v121_v7  ;;  %v1898_v6 = vor.u32 %v2278_v63, %v1897_v60  ;;  %v2026_v7 = vor.u32 %v2310_v1, %v2025_v0  ;;  %v1881_v8 = vld [vmem:[#allocation8 + $0x288] sm:$0xf]  ;;  %v2274_v9 = vld [vmem:[#allocation8 + $0x294] sm:$0xf0]  ;;  %v2216_v60 = vld [vmem:[#allocation8 + $0xcc] sm:$0xf] }
  0x9e   :  { %v1834_v63 = vor.u32 %v2262_v53, %v1833_v52  ;;  %v1962_v0 = vor.u32 %v2294_v55, %v1961_v54  ;;  %v1787_v1 = vld [vmem:[#allocation8 + $0x1d8] sm:$0xf0]  ;;  %v1614_v52 = vor.u32 %v2204_v40, %v1611_v41  ;;  %v2200_v54 = vld [vmem:[#allocation8 + $0x4c] sm:$0xf] }
  0x9f   :  { %v212_v16 = vmax.f32 %v150_v11, 0.0  ;;  %v213_v17 = vmax.f32 %v170_v12, 0.0  ;;  %v2306_v11 = vld [vmem:[#allocation8 + $0x394] sm:$0xf0]  ;;  %v1610_v12 = vor.u32 %v2206_v3, %v1609_v2  ;;  %v1817_v2 = vld [vmem:[#allocation8 + $0x208] sm:$0xf] }
  0xa0   :  { %v2258_v3 = vld [vmem:[#allocation8 + $0x214] sm:$0xf0]  ;;  %v1595_v55 = vld [vmem:[#allocation8 + $0x58] sm:$0xf0] }
  0xa1   :  { %v2614_v24 = vpack.c.bf16 %v212_v16, %v212_v16  ;;  %v2616_v25 = vpack.c.bf16 %v213_v17, %v213_v17  ;;  %v1721_v16 = vld [vmem:[#allocation8 + $0x148] sm:$0xf]  ;;  %v2234_v17 = vld [vmem:[#allocation8 + $0x154] sm:$0xf0]  ;;  %v2334_v40 = vld [vmem:[#allocation11 + $0x78] sm:$0xff] }
  0xa2   :  { %v1722_v27 = vor.u32 %v2234_v17, %v1721_v16  ;;  %v2244_v16 = vld [vmem:[#allocation8 + $0x1ac] sm:$0xf]  ;;  %v1771_v17 = vld [vmem:[#allocation8 + $0x1b8] sm:$0xf0] }
  0xa3   :  { %v189_v28 = vpop.f32.mrf.mxu2  ;;  %v209_v29 = vpop.f32.mrf.mxu3  ;;  %1006 = vmatmul.bf16.vlgmr.msrb.gmra.mxu0 %v2614_v24  ;;  %1019 = vmatmul.bf16.vlgmr.msrb.gmra.mxu1 %v2616_v25  ;;  %v2322_v41 = vld [vmem:[#allocation11 + $0x18] sm:$0xff] }
  0xa4   :  { %v190_v34 = vadd.f32 %v189_v28, %v122_v18  ;;  %v210_v35 = vadd.f32 %v209_v29, %v123_v19  ;;  %1102 = vmatpush.bf16.msrb.mxu0 %v1674_v20  ;;  %1115 = vmatpush.bf16.msrb.mxu1 %v1802_v21  ;;  %v1882_v18 = vor.u32 %v2274_v9, %v1881_v8  ;;  %v1865_v20 = vld [vmem:[#allocation8 + $0x268] sm:$0xf]  ;;  %v2270_v21 = vld [vmem:[#allocation8 + $0x274] sm:$0xf0]  ;;  %v2316_v8 = vld [vmem:[#allocation8 + $0x3ec] sm:$0xf] }
  0xa5   :  { %v2010_v19 = vor.u32 %v2306_v11, %v2009_v10  ;;  %v1577_v28 = vld [vmem:[#allocation8 + $0x28] sm:$0xf]  ;;  %v2198_v29 = vld [vmem:[#allocation8 + $0x34] sm:$0xf0]  ;;  %v1866_v32 = vor.u32 %v2270_v21, %v1865_v20  ;;  %v2059_v9 = vld [vmem:[#allocation8 + $0x3f8] sm:$0xf0] }
  0xa6   :  { %v214_v42 = vmax.f32 %v190_v34, 0.0  ;;  %v215_v43 = vmax.f32 %v210_v35, 0.0  ;;  %v1849_v34 = vld [vmem:[#allocation8 + $0x248] sm:$0xf]  ;;  %v2266_v35 = vld [vmem:[#allocation8 + $0x254] sm:$0xf0]  ;;  %v1578_v38 = vor.u32 %v2198_v29, %v1577_v28 }
  0xa7   :  { %v2280_v20 = vld [vmem:[#allocation8 + $0x2cc] sm:$0xf]  ;;  %v1915_v21 = vld [vmem:[#allocation8 + $0x2d8] sm:$0xf0] }
  0xa8   :  { %v2620_v49 = vpack.c.bf16 %v214_v42, %v214_v42  ;;  %v2622_v50 = vpack.c.bf16 %v215_v43, %v215_v43  ;;  %1103 = vmatpush.bf16.msrb.mxu0 %v1658_v30  ;;  %1116 = vmatpush.bf16.msrb.mxu1 %v1786_v36  ;;  %v1705_v30 = vld [vmem:[#allocation8 + $0x128] sm:$0xf]  ;;  %v2226_v43 = vld [vmem:[#allocation8 + $0x114] sm:$0xf0]  ;;  %v2208_v28 = vld [vmem:[#allocation8 + $0x8c] sm:$0xf] }
  0xa9   :  { %v1977_v36 = vld [vmem:[#allocation8 + $0x348] sm:$0xf]  ;;  %v1706_v39 = vor.u32 %v2230_v31, %v1705_v30  ;;  %v1627_v29 = vld [vmem:[#allocation8 + $0x98] sm:$0xf0]  ;;  %v2240_v30 = vld [vmem:[#allocation8 + $0x18c] sm:$0xf] }
  0xaa   :  { %1032 = vmatmul.bf16.vlgmr.msrb.gmra.mxu2 %v2620_v49  ;;  %1045 = vmatmul.bf16.vlgmr.msrb.gmra.mxu3 %v2622_v50  ;;  %v1689_v42 = vld [vmem:[#allocation8 + $0x108] sm:$0xf]  ;;  %v1978_v47 = vor.u32 %v2298_v37, %v1977_v36  ;;  %v1755_v31 = vld [vmem:[#allocation8 + $0x198] sm:$0xf0]  ;;  %v2308_v36 = vld [vmem:[#allocation8 + $0x3ac] sm:$0xf] }
  0xab   :  { %1128 = vmatpush.bf16.msrb.mxu2 %v1930_v44  ;;  %1141 = vmatpush.bf16.msrb.mxu3 %v2058_v45  ;;  %v2220_v44 = vld [vmem:[#allocation8 + $0xec] sm:$0xf]  ;;  %v1675_v45 = vld [vmem:[#allocation8 + $0xf8] sm:$0xf0]  ;;  %v1690_v57 = vor.u32 %v2226_v43, %v1689_v42 }
  0xac   :  { %1104 = vmatpush.bf16.msrb.mxu0 %v1642_v46  ;;  %1117 = vmatpush.bf16.msrb.mxu1 %v1770_v51  ;;  %v1850_v46 = vor.u32 %v2266_v35, %v1849_v34  ;;  %v1803_v51 = vld [vmem:[#allocation8 + $0x1f8] sm:$0xf0]  ;;  %v2276_v34 = vld [vmem:[#allocation8 + $0x2ac] sm:$0xf] }
  0xad   :  { %v1899_v35 = vld [vmem:[#allocation8 + $0x2b8] sm:$0xf0]  ;;  %v2236_v42 = vld [vmem:[#allocation8 + $0x16c] sm:$0xf] }
  0xae   :  { %v2027_v37 = vld [vmem:[#allocation8 + $0x3b8] sm:$0xf0] }
  0xaf   :  { %1129 = vmatpush.bf16.msrb.mxu2 %v1914_v58  ;;  %1142 = vmatpush.bf16.msrb.mxu3 %v2042_v59  ;;  %v1678_v58 = vor.u32 %v2220_v44, %v1675_v45  ;;  %v1806_v59 = vor.u32 %v2252_v48, %v1803_v51  ;;  %v1739_v43 = vld [vmem:[#allocation8 + $0x178] sm:$0xf0]  ;;  %v1902_v44 = vor.u32 %v2276_v34, %v1899_v35  ;;  %v2304_v48 = vld [vmem:[#allocation8 + $0x38c] sm:$0xf]  ;;  %v2325_v35 = vld [vmem:[#allocation11 + $0x30] sm:$0xff] }
  0xb0   :  { %1105 = vmatpush.bf16.msrb.mxu0 %v1626_v61  ;;  %1118 = vmatpush.bf16.msrb.mxu1 %v1754_v62  ;;  %v1659_v61 = vld [vmem:[#allocation8 + $0xd8] sm:$0xf0]  ;;  %v2248_v62 = vld [vmem:[#allocation8 + $0x1cc] sm:$0xf]  ;;  %v2030_v45 = vor.u32 %v2308_v36, %v2027_v37  ;;  %v1742_v53 = vor.u32 %v2236_v42, %v1739_v43  ;;  %v2321_v42 = vld [vmem:[#allocation11 + $0x10] sm:$0xff] }
  0xb1   :  { %v1662_v10 = vor.u32 %v2216_v60, %v1659_v61  ;;  %v1790_v11 = vor.u32 %v2248_v62, %v1787_v1  ;;  %v2011_v51 = vld [vmem:[#allocation8 + $0x398] sm:$0xf0]  ;;  %v2268_v60 = vld [vmem:[#allocation8 + $0x26c] sm:$0xf]  ;;  %v2333_v43 = vld [vmem:[#allocation11 + $0x70] sm:$0xff] }
  0xb2   :  { %v1867_v61 = vld [vmem:[#allocation8 + $0x278] sm:$0xf0]  ;;  %v2300_v62 = vld [vmem:[#allocation8 + $0x36c] sm:$0xf] }
  0xb3   :  { %1130 = vmatpush.bf16.msrb.mxu2 %v1898_v6  ;;  %1143 = vmatpush.bf16.msrb.mxu3 %v2026_v7  ;;  %v2284_v6 = vld [vmem:[#allocation8 + $0x2ec] sm:$0xf]  ;;  %v1931_v7 = vld [vmem:[#allocation8 + $0x2f8] sm:$0xf0] }
  0xb4   :  { %1058 = vmatmul.bf16.vlgmr.msra.gmra.mxu0 %v2614_v24  ;;  %1071 = vmatmul.bf16.vlgmr.msra.gmra.mxu1 %v2616_v25  ;;  %v1947_v34 = vld [vmem:[#allocation8 + $0x318] sm:$0xf0] }
  0xb5   :  { %1106 = vmatpush.bf16.msrb.mxu0 %v1610_v12  ;;  %1119 = vmatpush.bf16.msrb.mxu1 %v1738_v13  ;;  %v2212_v12 = vld [vmem:[#allocation8 + $0xac] sm:$0xf]  ;;  %v1818_v13 = vor.u32 %v2258_v3, %v1817_v2  ;;  %v1579_v3 = vld [vmem:[#allocation8 + $0x38] sm:$0xf0] }
  0xb6   :  { %v2196_v2 = vld [vmem:[#allocation8 + $0x2c] sm:$0xf] }
  0xb7   :  { %1131 = vmatpush.bf16.msrb.mxu2 %v1882_v18  ;;  %1144 = vmatpush.bf16.msrb.mxu3 %v2010_v19  ;;  %v1934_v18 = vor.u32 %v2284_v6, %v1931_v7  ;;  %v2062_v19 = vor.u32 %v2316_v8, %v2059_v9  ;;  %v1870_v6 = vor.u32 %v2268_v60, %v1867_v61  ;;  %v2264_v8 = vld [vmem:[#allocation8 + $0x24c] sm:$0xf]  ;;  %v1851_v9 = vld [vmem:[#allocation8 + $0x258] sm:$0xf0] }
  0xb9   :  { %1107 = vmatpush.bf16.msrb.mxu0 %v1594_v26  ;;  %1120 = vmatpush.bf16.msrb.mxu1 %v1722_v27  ;;  %v1646_v26 = vor.u32 %v2212_v12, %v1643_v15  ;;  %v1774_v27 = vor.u32 %v2244_v16, %v1771_v17  ;;  %v1582_v12 = vor.u32 %v2196_v2, %v1579_v3  ;;  %v1563_v15 = vld [vmem:[#allocation8 + $0x18] sm:$0xf0]  ;;  %v2224_v16 = vld [vmem:[#allocation8 + $0x10c] sm:$0xf] }
  0xba   :  { %1084 = vmatmul.bf16.vlgmr.msra.gmra.mxu2 %v2620_v49  ;;  %1097 = vmatmul.bf16.vlgmr.msra.gmra.mxu3 %v2622_v50  ;;  %v1691_v17 = vld [vmem:[#allocation8 + $0x118] sm:$0xf0]  ;;  %v2336_v3 = vld [vmem:[#allocation11 + $0x88] sm:$0xff] }
  0xbb   :  { %1132 = vmatpush.bf16.msrb.mxu2 %v1866_v32  ;;  %1145 = vmatpush.bf16.msrb.mxu3 %v1994_v33  ;;  %v1918_v32 = vor.u32 %v2280_v20, %v1915_v21  ;;  %v2046_v33 = vor.u32 %v2312_v22, %v2043_v23  ;;  %v2260_v20 = vld [vmem:[#allocation8 + $0x22c] sm:$0xf]  ;;  %v1835_v21 = vld [vmem:[#allocation8 + $0x238] sm:$0xf0] }
  0xbc   :  { %v2292_v22 = vld [vmem:[#allocation8 + $0x32c] sm:$0xf]  ;;  %v1963_v23 = vld [vmem:[#allocation8 + $0x338] sm:$0xf0] }
  0xbd   :  { %1108 = vmatpush.bf16.msrb.mxu0 %v1578_v38  ;;  %1121 = vmatpush.bf16.msrb.mxu1 %v1706_v39  ;;  %v1630_v38 = vor.u32 %v2208_v28, %v1627_v29  ;;  %v1758_v39 = vor.u32 %v2240_v30, %v1755_v31  ;;  %v2326_v28 = vld [vmem:[#allocation11 + $0x38] sm:$0xff]  ;;  %v1838_v29 = vor.u32 %v2260_v20, %v1835_v21  ;;  %v2256_v31 = vld [vmem:[#allocation8 + $0x20c] sm:$0xf] }
  0xbe   :  { %v1966_v30 = vor.u32 %v2292_v22, %v1963_v23  ;;  %v2347_v23 = vld [vmem:[#allocation11 + $0xe0] sm:$0xff] }
  0xbf   :  { %1133 = vmatpush.bf16.msrb.mxu2 %v1850_v46  ;;  %1146 = vmatpush.bf16.msrb.mxu3 %v1978_v47  ;;  %v2272_v46 = vld [vmem:[#allocation8 + $0x28c] sm:$0xf]  ;;  %v1883_v47 = vld [vmem:[#allocation8 + $0x298] sm:$0xf0] }
  0xc1   :  { %1109 = vmatpush.bf16.msrb.mxu0 %v1562_v56  ;;  %1122 = vmatpush.bf16.msrb.mxu1 %v1690_v57  ;;  %v2232_v56 = vld [vmem:[#allocation8 + $0x14c] sm:$0xf]  ;;  %v1723_v57 = vld [vmem:[#allocation8 + $0x158] sm:$0xf0] }
  0xc2   :  { %v1726_v1 = vor.u32 %v2232_v56, %v1723_v57  ;;  %v2327_v56 = vld [vmem:[#allocation11 + $0x40] sm:$0xff] }
  0xc3   :  { %1134 = vmatpush.bf16.msrb.mxu2 %v1834_v63  ;;  %1147 = vmatpush.bf16.msrb.mxu3 %v1962_v0  ;;  %v1995_v63 = vld [vmem:[#allocation8 + $0x378] sm:$0xf0]  ;;  %v1598_v0 = vor.u32 %v2200_v54, %v1595_v55  ;;  %v2339_v57 = vld [vmem:[#allocation11 + $0xa0] sm:$0xff] }
  0xc4   :  { %1110 = vmatmul.bf16.vlgmr.msrb.gmra.mxu0 %v2614_v24  ;;  %1123 = vmatmul.bf16.vlgmr.msrb.gmra.mxu1 %v2616_v25  ;;  %v1998_v7 = vor.u32 %v2300_v62, %v1995_v63  ;;  %v2337_v62 = vld [vmem:[#allocation11 + $0x90] sm:$0xff] }
  0xc5   :  { %1154 = vmatpush.bf16.msra.mxu0 %v1678_v58  ;;  %1167 = vmatpush.bf16.msra.mxu1 %v1806_v59  ;;  %v1886_v58 = vor.u32 %v2272_v46, %v1883_v47  ;;  %v2014_v59 = vor.u32 %v2304_v48, %v2011_v51  ;;  %v2329_v46 = vld [vmem:[#allocation11 + $0x50] sm:$0xff]  ;;  %v2328_v48 = vld [vmem:[#allocation11 + $0x48] sm:$0xff] }
  0xc6   :  { %v2341_v47 = vld [vmem:[#allocation11 + $0xb0] sm:$0xff]  ;;  %v2340_v51 = vld [vmem:[#allocation11 + $0xa8] sm:$0xff] }
  0xc7   :  { %1135 = vmatpush.bf16.msrb.mxu2 %v1818_v13  ;;  %1148 = vmatpush.bf16.msrb.mxu3 %v1946_v14  ;;  %v1710_v13 = vor.u32 %v2228_v4, %v1707_v5  ;;  %v2192_v14 = vld [vmem:[#allocation8 + $0xc] sm:$0xf] }
  0xc9   :  { %1155 = vmatpush.bf16.msra.mxu0 %v1662_v10  ;;  %1168 = vmatpush.bf16.msra.mxu1 %v1790_v11  ;;  %v2296_v10 = vld [vmem:[#allocation8 + $0x34c] sm:$0xf]  ;;  %v1979_v11 = vld [vmem:[#allocation8 + $0x358] sm:$0xf0] }
  0xca   :  { %1136 = vmatmul.bf16.vlgmr.msrb.gmra.mxu2 %v2620_v49  ;;  %1149 = vmatmul.bf16.vlgmr.msrb.gmra.mxu3 %v2622_v50 }
  0xcb   :  { %1180 = vmatpush.bf16.msra.mxu2 %v1934_v18  ;;  %1193 = vmatpush.bf16.msra.mxu3 %v2062_v19  ;;  %v1854_v18 = vor.u32 %v2264_v8, %v1851_v9  ;;  %v1982_v19 = vor.u32 %v2296_v10, %v1979_v11  ;;  %v2335_v8 = vld [vmem:[#allocation11 + $0x80] sm:$0xff]  ;;  %v2350_v9 = vld [vmem:[#allocation11 + $0xf8] sm:$0xff] }
  0xcd   :  { %1156 = vmatpush.bf16.msra.mxu0 %v1646_v26  ;;  %1169 = vmatpush.bf16.msra.mxu1 %v1774_v27  ;;  %v1566_v26 = vor.u32 %v2192_v14, %v1563_v15  ;;  %v1694_v27 = vor.u32 %v2224_v16, %v1691_v17  ;;  %v2349_v14 = vld [vmem:[#allocation11 + $0xf0] sm:$0xff]  ;;  %v2348_v16 = vld [vmem:[#allocation11 + $0xe8] sm:$0xff] }
  0xcf   :  { %1181 = vmatpush.bf16.msra.mxu2 %v1918_v32  ;;  %1194 = vmatpush.bf16.msra.mxu3 %v2046_v33  ;;  %v1819_v32 = vld [vmem:[#allocation8 + $0x218] sm:$0xf0]  ;;  %v2288_v33 = vld [vmem:[#allocation8 + $0x30c] sm:$0xf] }
  0xd0   :  { %v1822_v36 = vor.u32 %v2256_v31, %v1819_v32  ;;  %v1950_v37 = vor.u32 %v2288_v33, %v1947_v34 }
  0xd1   :  { %1157 = vmatpush.bf16.msra.mxu0 %v1630_v38  ;;  %1170 = vmatpush.bf16.msra.mxu1 %v1758_v39  ;;  %v2324_v38 = vld [vmem:[#allocation11 + $0x28] sm:$0xff]  ;;  %v2323_v39 = vld [vmem:[#allocation11 + $0x20] sm:$0xff] }
  0xd3   :  { %1182 = vmatpush.bf16.msra.mxu2 %v1902_v44  ;;  %1195 = vmatpush.bf16.msra.mxu3 %v2030_v45  ;;  %v2319_v44 = vld [vmem:[#allocation11] sm:$0xff] }
  0xd4   :  { %v2331_v45 = vld [vmem:[#allocation11 + $0x60] sm:$0xff] }
  0xd5   :  { %1158 = vmatpush.bf16.msra.mxu0 %v1614_v52  ;;  %1171 = vmatpush.bf16.msra.mxu1 %v1742_v53  ;;  %v2638_v52 = vld [vmem:[#allocation10] sm:$0xf] }
  0xd6   :  { %v350_v55 = vperm.slane %v2638_v52, 0  ;;  %v351_v11 = vperm.slane %v2638_v52, 1  ;;  %v352_v32 = vperm.slane %v2638_v52, 2 }
  0xd7   :  { %1183 = vmatpush.bf16.msra.mxu2 %v1886_v58  ;;  %1196 = vmatpush.bf16.msra.mxu3 %v2014_v59  ;;  %v2338_v59 = vld [vmem:[#allocation11 + $0x98] sm:$0xff] }
  0xd9   :  { %1159 = vmatpush.bf16.msra.mxu0 %v1598_v0  ;;  %1172 = vmatpush.bf16.msra.mxu1 %v1726_v1 }
  0xdb   :  { %1184 = vmatpush.bf16.msra.mxu2 %v1870_v6  ;;  %1197 = vmatpush.bf16.msra.mxu3 %v1998_v7 }
  0xdd   :  { %1160 = vmatpush.bf16.msra.mxu0 %v1582_v12  ;;  %1173 = vmatpush.bf16.msra.mxu1 %v1710_v13 }
  0xdf   :  { %1185 = vmatpush.bf16.msra.mxu2 %v1854_v18  ;;  %1198 = vmatpush.bf16.msra.mxu3 %v1982_v19 }
  0xe1   :  { %1161 = vmatpush.bf16.msra.mxu0 %v1566_v26  ;;  %1174 = vmatpush.bf16.msra.mxu1 %v1694_v27 }
  0xe3   :  { %1186 = vmatpush.bf16.msra.mxu2 %v1838_v29  ;;  %1199 = vmatpush.bf16.msra.mxu3 %v1966_v30  ;;  %v2346_v29 = vld [vmem:[#allocation11 + $0xd8] sm:$0xff] }
  0xe4   :  { %1162 = vmatmul.bf16.vlgmr.msra.gmra.mxu0 %v2614_v24  ;;  %1175 = vmatmul.bf16.vlgmr.msra.gmra.mxu1 %v2616_v25  ;;  %v2320_v24 = vld [vmem:[#allocation11 + $0x8] sm:$0xff] }
  0xe5   :  { %1474 = vmatpush.bf16.msrb.mxu0 %v2326_v28  ;;  %1487 = vmatpush.bf16.msrb.mxu1 %v2334_v40  ;;  %v2332_v25 = vld [vmem:[#allocation11 + $0x68] sm:$0xff] }
  0xe7   :  { %1187 = vmatpush.bf16.msra.mxu2 %v1822_v36  ;;  %1200 = vmatpush.bf16.msra.mxu3 %v1950_v37 }
  0xe9   :  { %1475 = vmatpush.bf16.msrb.mxu0 %v2325_v35  ;;  %1488 = vmatpush.bf16.msrb.mxu1 %v2333_v43  ;;  %v2345_v35 = vld [vmem:[#allocation11 + $0xd0] sm:$0xff]  ;;  %v2343_v43 = vld [vmem:[#allocation11 + $0xc0] sm:$0xff] }
  0xea   :  { %1188 = vmatmul.bf16.vlgmr.msra.gmra.mxu2 %v2620_v49  ;;  %1201 = vmatmul.bf16.vlgmr.msra.gmra.mxu3 %v2622_v50  ;;  %v2330_v49 = vld [vmem:[#allocation11 + $0x58] sm:$0xff] }
  0xeb   :  { %v2342_v50 = vld [vmem:[#allocation11 + $0xb8] sm:$0xff]  ;;  %1513 = vmatpush.bf16.msrb.mxu3 %v2350_v9 }
  0xec   :  { %1500 = vmatpush.bf16.msrb.mxu2 %v2342_v50 }
  0xed   :  { %1476 = vmatpush.bf16.msrb.mxu0 %v2324_v38  ;;  %1489 = vmatpush.bf16.msrb.mxu1 %v2332_v25 }
  0xef   :  { %1514 = vmatpush.bf16.msrb.mxu3 %v2349_v14 }
  0xf0   :  { %1501 = vmatpush.bf16.msrb.mxu2 %v2341_v47 }
  0xf1   :  { %1477 = vmatpush.bf16.msrb.mxu0 %v2323_v39  ;;  %1490 = vmatpush.bf16.msrb.mxu1 %v2331_v45  ;;  %v2344_v39 = vld [vmem:[#allocation11 + $0xc8] sm:$0xff] }
  0xf3   :  { %1515 = vmatpush.bf16.msrb.mxu3 %v2348_v16 }
  0xf4   :  { %1502 = vmatpush.bf16.msrb.mxu2 %v2340_v51 }
  0xf5   :  { %1478 = vmatpush.bf16.msrb.mxu0 %v2322_v41  ;;  %1491 = vmatpush.bf16.msrb.mxu1 %v2330_v49 }
  0xf7   :  { %1516 = vmatpush.bf16.msrb.mxu3 %v2347_v23 }
  0xf8   :  { %1503 = vmatpush.bf16.msrb.mxu2 %v2339_v57 }
  0xf9   :  { %1479 = vmatpush.bf16.msrb.mxu0 %v2321_v42  ;;  %1492 = vmatpush.bf16.msrb.mxu1 %v2329_v46 }
  0xfb   :  { %1517 = vmatpush.bf16.msrb.mxu3 %v2346_v29 }
  0xfc   :  { %1504 = vmatpush.bf16.msrb.mxu2 %v2338_v59 }
  0xfd   :  { %1480 = vmatpush.bf16.msrb.mxu0 %v2320_v24  ;;  %1493 = vmatpush.bf16.msrb.mxu1 %v2328_v48  ;;  %v353_v48 = vperm.slane %v2638_v52, 3  ;;  %v2362_v52 = vld [vmem:[%s2656_s6] ss:$0 sm:$0xff] }
  0xff   :  { %1518 = vmatpush.bf16.msrb.mxu3 %v2345_v35 }
 0x100   :  { %1505 = vmatpush.bf16.msrb.mxu2 %v2337_v62 }
 0x101   :  { %1481 = vmatpush.bf16.msrb.mxu0 %v2319_v44  ;;  %1494 = vmatpush.bf16.msrb.mxu1 %v2327_v56 }
 0x103   :  { %1519 = vmatpush.bf16.msrb.mxu3 %v2344_v39 }
 0x104   :  { %1506 = vmatpush.bf16.msrb.mxu2 %v2336_v3 }
 0x107   :  { %1520 = vmatpush.bf16.msrb.mxu3 %v2343_v43 }
 0x108   :  { %1507 = vmatpush.bf16.msrb.mxu2 %v2335_v8 }
 0x120   :  { %v1007_v53 = vpop.f32.mrf.mxu0  ;;  %v1020_v54 = vpop.f32.mrf.mxu1 }
 0x121   :  { %v1008_v58 = vadd.f32 %v1007_v53, %v350_v55 }
 0x123   :  { %v1021_v63 = vadd.f32 %v1020_v54, %v1008_v58 }
 0x128   :  { %v1009_v60 = vpop.f32.mrf.mxu0  ;;  %v1022_v61 = vpop.f32.mrf.mxu1 }
 0x12d   :  { %v1033_v0 = vpop.f32.mrf.mxu2  ;;  %v1046_v1 = vpop.f32.mrf.mxu3 }
 0x12e   :  { %v1034_v2 = vadd.f32 %v1033_v0, %v1021_v63 }
 0x130   :  { %v1047_v4 = vadd.f32 %v1046_v1, %v1034_v2 }
 0x131   :  { %v1059_v5 = vpop.f32.mrf.mxu0  ;;  %v1072_v6 = vpop.f32.mrf.mxu1 }
 0x132   :  { %v1206_v7 = vmax.f32 %v1047_v4, 0.0  ;;  %v1060_v15 = vadd.f32 %v1059_v5, %v351_v11 }
 0x134   :  { %v1210_v10 = vpack.c.bf16 %v1206_v7, %v1206_v7  ;;  %v1073_v19 = vadd.f32 %v1072_v6, %v1060_v15 }
 0x135   :  { %v1035_v12 = vpop.f32.mrf.mxu2  ;;  %v1048_v13 = vpop.f32.mrf.mxu3 }
 0x136   :  { %1482 = vmatmul.bf16.vlgmr.msrb.gmra.mxu0 %v1210_v10 }
 0x139   :  { %v1061_v17 = vpop.f32.mrf.mxu0  ;;  %v1074_v18 = vpop.f32.mrf.mxu1 }
 0x13d   :  { %v1085_v20 = vpop.f32.mrf.mxu2  ;;  %v1098_v21 = vpop.f32.mrf.mxu3 }
 0x13e   :  { %v1086_v22 = vadd.f32 %v1085_v20, %v1073_v19 }
 0x140   :  { %v1099_v26 = vadd.f32 %v1098_v21, %v1086_v22 }
 0x141   :  { %v1111_v27 = vpop.f32.mrf.mxu0  ;;  %v1124_v28 = vpop.f32.mrf.mxu1 }
 0x142   :  { %v1207_v30 = vmax.f32 %v1099_v26, 0.0  ;;  %v1112_v36 = vadd.f32 %v1111_v27, %v352_v32 }
 0x144   :  { %v1211_v31 = vpack.c.bf16 %v1207_v30, %v1207_v30  ;;  %v1125_v40 = vadd.f32 %v1124_v28, %v1112_v36 }
 0x145   :  { %v1087_v33 = vpop.f32.mrf.mxu2  ;;  %v1100_v34 = vpop.f32.mrf.mxu3 }
 0x146   :  { %1495 = vmatmul.bf16.vlgmr.msrb.gmra.mxu1 %v1211_v31 }
 0x149   :  { %v1113_v37 = vpop.f32.mrf.mxu0  ;;  %v1126_v38 = vpop.f32.mrf.mxu1 }
 0x14d   :  { %v1137_v41 = vpop.f32.mrf.mxu2  ;;  %v1150_v42 = vpop.f32.mrf.mxu3 }
 0x14e   :  { %v1138_v24 = vadd.f32 %v1137_v41, %v1125_v40 }
 0x150   :  { %v1151_v25 = vadd.f32 %v1150_v42, %v1138_v24 }
 0x152   :  { %v1208_v44 = vmax.f32 %v1151_v25, 0.0 }
 0x154   :  { %v1212_v45 = vpack.c.bf16 %v1208_v44, %v1208_v44 }
 0x155   :  { %v1139_v49 = vpop.f32.mrf.mxu2  ;;  %v1152_v50 = vpop.f32.mrf.mxu3 }
 0x156   :  { %1508 = vmatmul.bf16.vlgmr.msrb.gmra.mxu2 %v1212_v45 }
 0x161   :  { %v1163_v46 = vpop.f32.mrf.mxu0  ;;  %v1176_v47 = vpop.f32.mrf.mxu1 }
 0x162   :  { %v1164_v51 = vadd.f32 %v1163_v46, %v353_v48 }
 0x164   :  { %v1177_v55 = vadd.f32 %v1176_v47, %v1164_v51 }
 0x169   :  { %v1165_v53 = vpop.f32.mrf.mxu0  ;;  %v1178_v54 = vpop.f32.mrf.mxu1 }
 0x16d   :  { %v1189_v56 = vpop.f32.mrf.mxu2  ;;  %v1202_v57 = vpop.f32.mrf.mxu3 }
 0x16e   :  { %v1190_v58 = vadd.f32 %v1189_v56, %v1177_v55 }
 0x170   :  { %v1203_v59 = vadd.f32 %v1202_v57, %v1190_v58 }
 0x172   :  { %v1209_v60 = vmax.f32 %v1203_v59, 0.0 }
 0x174   :  { %v1213_v61 = vpack.c.bf16 %v1209_v60, %v1209_v60 }
 0x175   :  { %v1191_v62 = vpop.f32.mrf.mxu2  ;;  %v1204_v63 = vpop.f32.mrf.mxu3 }
 0x176   :  { %1521 = vmatmul.bf16.vlgmr.msrb.gmra.mxu3 %v1213_v61 }
 0x1b3   :  { %v1483_v0 = vpop.f32.mrf.mxu0 }
 0x1b4   :  { %v1484_v6 = vadd.f32 %v2362_v52, %v1483_v0 }
 0x1bb   :  { %v1485_v1 = vpop.f32.mrf.mxu0 }
 0x1c3   :  { %v1496_v2 = vpop.f32.mrf.mxu1 }
 0x1c4   :  { %v1497_v7 = vadd.f32 %v1496_v2, %v1484_v6 }
 0x1cb   :  { %v1498_v3 = vpop.f32.mrf.mxu1 }
 0x1d9   :  { %v1509_v4 = vpop.f32.mrf.mxu2 }
 0x1da   :  { %v1510_v8 = vadd.f32 %v1509_v4, %v1497_v7 }
 0x1e1   :  { %v1511_v5 = vpop.f32.mrf.mxu2 }
 0x1f9   :  { %v1522_v9 = vpop.f32.mrf.mxu3 }
 0x1fa   :  { %v1523_v10 = vadd.f32 %v1522_v9, %v1510_v8 }
 0x1fc   :  { %1526 = vst [vmem:[#allocation13] sm:$0xff] %v1523_v10 }
 0x1fd   :  { %1537 = dma.vmem_to_hbm [thread:$0]  %s1533_s9, 128, %s1535_s12, [#allocation4]  }
 0x201   :  { %v1524_v11 = vpop.f32.mrf.mxu3 }
 0x202   :  { %2539 = dma.done.wait [#allocation4], 128  }
 0x203   :  { %2540 = vsyncadd [#allocation4], 4294967168 }
 0x204   :  { %1542 = vsyncpa [#allocation3], 1 }
 0x205   :  { %1543 = vsyncpa [#allocation6], 1 }
 0x206   :  { %1544 = vsyncpa [#allocation9], 1 }
 0x207   :  { %1545 = vsyncpa [#allocation12], 1 }
 0x208   :  { %1546 = vsyncpa [#allocation4], 1 }

</bundles_post_ra>
